<compile_context>
chip_gen: v7x
topology: tpu7x:2x2x1
jax: 0.10.0
libtpu: 0.0.40
codegen_flags: <defaults>
</compile_context>

<pallas_src>
import jax
import jax.numpy as jnp
from jax.experimental import pallas as pl
from jax.experimental.pallas import tpu as pltpu


_PER_TILE_BYTES = 2 * 1024 * 1024   # target per-array tile size
_TM_MAX = 2048                      # hard row cap per tile
_TM_MIN_SPLIT = 512                 # never split below this many rows/step


def cross_layer_kernel(x0_ref, xl_ref, wb_ref, o_ref):
    x0 = x0_ref[...].astype(jnp.float32)        # (tm, D)
    xl = xl_ref[...].astype(jnp.float32)        # (tm, D)
    w = wb_ref[0:1, :].astype(jnp.float32)      # (1, D)  lane-major weight row
    b = wb_ref[1:2, :].astype(jnp.float32)      # (1, D)  bias row
    # matvec as VPU multiply + lane (XLU) reduce: (tm, D) -> (tm, 1)
    s = jnp.sum(xl * w, axis=-1, keepdims=True)
    xl_w = s + b                                # broadcast -> (tm, D)
    o_ref[...] = (x0 * xl_w + xl).astype(o_ref.dtype)


def _choose_tm(B, D, itemsize):
    """Pick the batch tile size.

    * per-array tile <= ~2 MiB and <= 2048 rows (mem-bound kernels hit the
      HBM roofline by ~512-1024 rows; bigger only hurts pipelining/VMEM),
    * rows rounded to the dtype's sublane-packing multiple,
    * >= 4 grid steps preferred when each step keeps >= 512 rows (balanced
      v7x megacore sharding), never split tiny batches,
    * even step count preferred when splitting.
    """
    sub = {4: 8, 2: 16, 1: 32}.get(itemsize, 8)
    lanes = -(-D // 128) * 128                   # physical lane footprint
    tm_cap = (_PER_TILE_BYTES // (lanes * itemsize)) // sub * sub
    tm_cap = max(sub, min(tm_cap, _TM_MAX))

    b_pad = -(-B // sub) * sub
    tm = min(tm_cap, b_pad)

    # Prefer >= 4 grid steps (>= 2 per TensorCore on v7x) when the batch is
    # big enough that each step still moves a useful amount of data.
    if b_pad // tm < 4:
        tm4 = (b_pad // 4) // sub * sub
        if tm4 >= _TM_MIN_SPLIT:
            tm = tm4

    # Prefer an even number of steps when splitting (balanced megacore load).
    steps = -(-b_pad // tm)
    if steps > 1 and steps % 2 == 1:
        tm_even = -(-(-(-b_pad // (steps + 1))) // sub) * sub
        if tm_even >= sub:
            tm = tm_even

    return max(tm, sub)


def _vmem_limit_bytes():
    """Generation-aware scoped-VMEM limit with a conservative fallback."""
    try:
        cap = pltpu.get_tpu_info().vmem_capacity_bytes
    except Exception:
        cap = 64 * 1024 * 1024
    # Half of physical capacity, clamped to [32 MiB, 48 MiB]: plenty for the
    # ~12 MiB of pipelined tiles + f32 temps, with headroom on v7x (64 MiB).
    return int(min(48 * 1024 * 1024, max(32 * 1024 * 1024, cap // 2)))


def cross_layers_v2(x0, xl, weights, bias):
    B, D = x0.shape
    assert xl.shape == (B, D)
    assert weights.shape == (D, 1)
    assert bias.shape == (D,)

    # Pack W and b into one tiny resident (2, D) input (lane-major rows).
    wb = jnp.concatenate(
        [weights.reshape(1, D).astype(x0.dtype),
         bias.reshape(1, D).astype(x0.dtype)],
        axis=0,
    )

    tm = _choose_tm(B, D, jnp.dtype(x0.dtype).itemsize)
    grid = (pl.cdiv(B, tm),)

    out = pl.pallas_call(
        cross_layer_kernel,
        out_shape=jax.ShapeDtypeStruct((B, D), x0.dtype),
        grid_spec=pltpu.PrefetchScalarGridSpec(
            num_scalar_prefetch=0,
            grid=grid,
            in_specs=[
                pl.BlockSpec((tm, D), lambda i: (i, 0)),   # x0 tile
                pl.BlockSpec((tm, D), lambda i: (i, 0)),   # xl tile
                pl.BlockSpec((2, D), lambda i: (0, 0)),    # [W; b] resident
            ],
            out_specs=pl.BlockSpec((tm, D), lambda i: (i, 0)),
        ),
        compiler_params=pltpu.CompilerParams(
            dimension_semantics=("parallel",),
            vmem_limit_bytes=_vmem_limit_bytes(),
        ),
    )(x0, xl, wb)

    return out


def reference(x0, xl, weights, bias):
    xl_w = xl @ weights + bias   # (B,1) + (D,) -> (B,D)
    return x0 * xl_w + xl


if __name__ == "__main__":
    key = jax.random.PRNGKey(0)
    B, D = 16, 128  # batch, input_dim
    k0, k1, kw = jax.random.split(key, 3)

    x0 = jax.random.normal(k0, (B, D), dtype=jnp.float32)
    xl = jax.random.normal(k1, (B, D), dtype=jnp.float32)
    # Deterministic parameter init (torch.randn-like weights, zeros bias).
    weights = jax.random.normal(kw, (D, 1), dtype=jnp.float32)
    bias = jnp.zeros((D,), dtype=jnp.float32)

    out = cross_layers_v2(x0, xl, weights, bias)
    jax.block_until_ready(out)

    ref = reference(x0, xl, weights, bias)
    assert out.shape == (B, D)
    assert jnp.allclose(out, ref, atol=1e-5, rtol=1e-5), "mismatch vs reference"
    print("KERNEL_OK")
</pallas_src>

<mosaic_0001>
module attributes {stable_mosaic.version = 11 : i64} {
  func.func @cross_layer_kernel(%arg0: i32, %arg1: memref<16x128xf32, #tpu.memory_space<vmem>>, %arg2: memref<16x128xf32, #tpu.memory_space<vmem>>, %arg3: memref<2x128xf32, #tpu.memory_space<vmem>>, %arg4: memref<16x128xf32, #tpu.memory_space<vmem>>) attributes {dimension_semantics = [#tpu.dimension_semantics<parallel>], iteration_bounds = array<i64: 1>, scalar_prefetch = 0 : i64, scratch_operands = 0 : i64, tpu.core_type = #tpu.core_type<tc>, window_params = [{transform_indices = @transform_0, window_bounds = array<i64: 16, 128>}, {transform_indices = @transform_1, window_bounds = array<i64: 16, 128>}, {pipeline_mode = #tpu.pipeline_mode<synchronous>, transform_indices = @transform_2, window_bounds = array<i64: 2, 128>}, {transform_indices = @transform_3, window_bounds = array<i64: 16, 128>}]} {
    %c0 = arith.constant 0 : index
    %c0_0 = arith.constant 0 : index
    %0 = vector.load %arg1[%c0, %c0_0] : memref<16x128xf32, #tpu.memory_space<vmem>>, vector<16x128xf32>
    %c0_1 = arith.constant 0 : index
    %c0_2 = arith.constant 0 : index
    %1 = vector.load %arg2[%c0_1, %c0_2] : memref<16x128xf32, #tpu.memory_space<vmem>>, vector<16x128xf32>
    %c0_3 = arith.constant 0 : index
    %c0_4 = arith.constant 0 : index
    %2 = vector.load %arg3[%c0_3, %c0_4] : memref<2x128xf32, #tpu.memory_space<vmem>>, vector<1x128xf32>
    %c1 = arith.constant 1 : index
    %c0_5 = arith.constant 0 : index
    %3 = vector.load %arg3[%c1, %c0_5] : memref<2x128xf32, #tpu.memory_space<vmem>>, vector<1x128xf32>
    %4 = vector.broadcast %2 : vector<1x128xf32> to vector<16x128xf32>
    %5 = arith.mulf %1, %4 : vector<16x128xf32>
    %cst = arith.constant dense<0.000000e+00> : vector<16xf32>
    %6 = vector.multi_reduction <add>, %5, %cst [1] : vector<16x128xf32> to vector<16xf32>
    %7 = vector.shape_cast %6 : vector<16xf32> to vector<16x1xf32>
    %8 = vector.broadcast %7 : vector<16x1xf32> to vector<16x128xf32>
    %9 = vector.broadcast %3 : vector<1x128xf32> to vector<16x128xf32>
    %10 = arith.addf %8, %9 : vector<16x128xf32>
    %11 = arith.mulf %0, %10 : vector<16x128xf32>
    %12 = arith.addf %11, %1 : vector<16x128xf32>
    %c0_6 = arith.constant 0 : index
    %c0_7 = arith.constant 0 : index
    %13 = vector.load %arg4[%c0_6, %c0_7] : memref<16x128xf32, #tpu.memory_space<vmem>>, vector<16x128xf32>
    tpu.vector_store %arg4[%c0_6, %c0_7], %12 {strides = array<i32>} : memref<16x128xf32, #tpu.memory_space<vmem>>, vector<16x128xf32>,
    return
  }
  func.func @transform_0(%arg0: i32) -> (i32, i32) {
    %c0_i32 = arith.constant 0 : i32
    %c0_i32_0 = arith.constant 0 : i32
    return %arg0, %c0_i32 : i32, i32
  }
  func.func @transform_1(%arg0: i32) -> (i32, i32) {
    %c0_i32 = arith.constant 0 : i32
    %c0_i32_0 = arith.constant 0 : i32
    return %arg0, %c0_i32 : i32, i32
  }
  func.func @transform_2(%arg0: i32) -> (i32, i32) {
    %c0_i32 = arith.constant 0 : i32
    %c0_i32_0 = arith.constant 0 : i32
    %c0_i32_1 = arith.constant 0 : i32
    return %c0_i32, %c0_i32_0 : i32, i32
  }
  func.func @transform_3(%arg0: i32) -> (i32, i32) {
    %c0_i32 = arith.constant 0 : i32
    %c0_i32_0 = arith.constant 0 : i32
    return %arg0, %c0_i32 : i32, i32
  }
}

</mosaic_0001>

<bundles_post_ra>
// kernel: tpu_custom_call.1
= control target key start
LH: loop header
LB: loop body
LE: loop exit
PB: predicated region body
PF: predicated region fallthrough
CT: control target
= control target key end

     0   :  { %8 = vsyncpa [#allocation3], 0  ;;  %s244_s0 = inlined_call_operand.hbm [shape: f32[16,128], index: 0, kind: input, shape index: {}]   ;;  %s245_s1 = inlined_call_operand.hbm [shape: f32[16,128], index: 1, kind: input, shape index: {}]   ;;  %s246_s2 = inlined_call_operand.vmem [shape: f32[2,128], index: 2, kind: input, shape index: {}]   ;;  %s247_s3 = inlined_call_operand.hbm [shape: f32[16,128], index: 3, kind: output, shape index: {}]  }
   0x1   :  { %9 = vsyncpa [#allocation6], 0 }
   0x2   :  { %10 = vsyncpa [#allocation4], 0  ;;  %s168_s12 = smov [#allocation2]   ;;  %s96_s16 = scalar_lea.hbm %s244_s0, 256 }
   0x3   :  { %s16_s13 = sshll.u32 %s168_s12, 4  ;;  %p97_p0 = scmp.ne.s32.totalorder %s244_s0, %s96_s16  ;;  %s17_s13 = int_to_ptr.vmem [resolvable:$true] %s16_s13 }
   0x4   :  { %p100_p1 = scmp.lt.u32.totalorder %s96_s16, %s244_s0 }
   0x6   :  { %p102_p2 = pnand %p100_p1, %p97_p0 }
   0x8   :  { %105 = shalt.err (!%p102_p2)
}
   0x9   :  { %s106_s21 = scalar_lea.vmem %s17_s13, 256  ;;  %p111_p4 = scmp.lt.s32.totalorder %s17_s13, %s17_s13 }
   0xa   :  { %p107_p3 = scmp.ne.s32.totalorder %s17_s13, %s106_s21  ;;  %p112_p5 = scmp.lt.s32.totalorder %s106_s21, %s106_s21 }
   0xc   :  { %p113_p6 = por %p112_p5, %p111_p4 }
   0xe   :  { %p114_p7 = pnand %p113_p6, %p107_p3 }
  0x10   :  { %117 = shalt.err (!%p114_p7)
}
  0x11   :  { %s169_s22 = smov 128   ;;  %s170_s23 = smov 8  }
  0x12   :  { %22 = dma.hbm_to_vmem [thread:$0]  %s244_s0, 256, %s17_s13, [#allocation3], %s169_s22, %s169_s22, %s170_s23  }
  0x13   :  { %s171_s26 = smov [#allocation5]   ;;  %s118_s30 = scalar_lea.hbm %s245_s1, 256 }
  0x14   :  { %s28_s27 = sshll.u32 %s171_s26, 4  ;;  %p119_p8 = scmp.ne.s32.totalorder %s245_s1, %s118_s30  ;;  %s29_s27 = int_to_ptr.vmem [resolvable:$true] %s28_s27 }
  0x15   :  { %p122_p9 = scmp.lt.u32.totalorder %s118_s30, %s245_s1 }
  0x17   :  { %p124_p10 = pnand %p122_p9, %p119_p8 }
  0x19   :  { %127 = shalt.err (!%p124_p10)
}
  0x1a   :  { %s128_s8 = scalar_lea.vmem %s29_s27, 256  ;;  %p133_p12 = scmp.lt.s32.totalorder %s29_s27, %s29_s27 }
  0x1b   :  { %p129_p11 = scmp.ne.s32.totalorder %s29_s27, %s128_s8  ;;  %p134_p13 = scmp.lt.s32.totalorder %s128_s8, %s128_s8 }
  0x1d   :  { %p135_p0 = por %p134_p13, %p133_p12 }
  0x1f   :  { %p136_p1 = pnand %p135_p0, %p129_p11 }
  0x21   :  { %139 = shalt.err (!%p136_p1)
}
  0x22   :  { %34 = dma.hbm_to_vmem [thread:$0]  %s245_s1, 256, %s29_s27, [#allocation6], %s169_s22, %s169_s22, %s170_s23  }
  0x23   :  { %162 = dma.done.wait [#allocation3], 256  }
  0x24   :  { %163 = vsyncadd [#allocation3], 4294967040 }
  0x25   :  { %164 = dma.done.wait [#allocation6], 256  }
  0x26   :  { %165 = vsyncadd [#allocation6], 4294967040  ;;  %v45_v0 = vld [vmem:[#allocation5] sm:$0xff]  ;;  %v89_v1 = vld [vmem:[%s246_s2] ss:$0 sm:$0xff]  ;;  %s172_s1 = smov [#allocation7]  }
  0x27   :  { %v46_v2 = vld [vmem:[#allocation5 + $0x8] sm:$0xff]  ;;  %v53_v3 = vmul.f32 %v89_v1, %v45_v0  ;;  %v90_v5 = vld [vmem:[%s246_s2 + $0x1] ss:$0 sm:$0xff]  ;;  %v44_v11 = vld [vmem:[#allocation2 + $0x8] sm:$0xff]  ;;  %s76_s14 = sshll.u32 %s172_s1, 4  ;;  %s77_s14 = int_to_ptr.vmem [resolvable:$true] %s76_s14 }
  0x28   :  { %v54_v4 = vmul.f32 %v89_v1, %v46_v2  ;;  %v43_v7 = vld [vmem:[#allocation2] sm:$0xff]  ;;  %s140_s15 = scalar_lea.vmem %s77_s14, 256  ;;  %p145_p3 = scmp.lt.s32.totalorder %s77_s14, %s77_s14 }
  0x29   :  { %55 = vadd.xlane.f32.xlu0 %v53_v3  ;;  %p141_p2 = scmp.ne.s32.totalorder %s77_s14, %s140_s15  ;;  %p146_p4 = scmp.lt.s32.totalorder %s140_s15, %s140_s15 }
  0x2b   :  { %p147_p5 = por %p146_p4, %p145_p3 }
  0x2d   :  { %57 = vadd.xlane.f32.xlu0 %v54_v4  ;;  %p148_p6 = pnand %p147_p5, %p141_p2 }
  0xb6   :  { %v56_v6 = vpop.xlane.xlu0 %55 }
  0xb7   :  { %v63_v8 = vadd.f32 %v90_v5, %v56_v6 }
  0xb9   :  { %v65_v9 = vmul.f32 %v63_v8, %v43_v7 }
  0xba   :  { %v58_v10 = vpop.xlane.xlu0 %57 }
  0xbb   :  { %v67_v12 = vadd.f32 %v65_v9, %v45_v0  ;;  %v64_v13 = vadd.f32 %v90_v5, %v58_v10 }
  0xbd   :  { %69 = vst [vmem:[#allocation7] sm:$0xff] %v67_v12  ;;  %v66_v14 = vmul.f32 %v64_v13, %v44_v11 }
  0xbf   :  { %v68_v15 = vadd.f32 %v66_v14, %v46_v2 }
  0xc1   :  { %70 = vst [vmem:[#allocation7 + $0x8] sm:$0xff] %v68_v15 }
  0xc2   :  { %151 = shalt.err (!%p148_p6)
}
  0xc3   :  { %s152_s17 = scalar_lea.hbm %s247_s3, 256 }
  0xc4   :  { %p153_p7 = scmp.ne.s32.totalorder %s247_s3, %s152_s17  ;;  %p156_p8 = scmp.lt.u32.totalorder %s152_s17, %s247_s3 }
  0xc6   :  { %p158_p9 = pnand %p156_p8, %p153_p7 }
  0xc8   :  { %161 = shalt.err (!%p158_p9)
}
  0xc9   :  { %82 = dma.vmem_to_hbm [thread:$0]  %s77_s14, 256, %s247_s3, [#allocation4], %s169_s22, %s169_s22, %s170_s23  }
  0xca   :  { %166 = dma.done.wait [#allocation4], 256  }
  0xcb   :  { %167 = vsyncadd [#allocation4], 4294967040 }
  0xcc   :  { %86 = vsyncpa [#allocation3], 1 }
  0xcd   :  { %87 = vsyncpa [#allocation6], 1 }
  0xce   :  { %88 = vsyncpa [#allocation4], 1 }

</bundles_post_ra>
